<compile_context>
chip_gen: v7x
topology: tpu7x:2x2x1
jax: 0.10.0
libtpu: 0.0.40
codegen_flags: <defaults>
</compile_context>

<pallas_src>
import functools

import jax
import jax.numpy as jnp
from jax.experimental import pallas as pl
from jax.experimental.pallas import tpu as pltpu

LANE = 128             # TPU lane width (used to pad the 64-wide hidden layer)
MAX_BATCH_TILE = 2048  # upper bound on rows per grid step
MIN_SPLIT_ROWS = 256   # don't bother splitting smaller batches across cores


def _round_up(n, m):
    return ((n + m - 1) // m) * m


def _cdiv(a, b):
    return -(-a // b)


def _pad2d(a, rows, cols):
    r, c = a.shape
    return jnp.pad(a, ((0, rows - r), (0, cols - c)))


def _choose_batch_tile(batch):
    """Batch tile: multiple of 16, <= MAX_BATCH_TILE, and (when the batch is
    large enough to split) an even number of balanced grid steps so v7x's two
    TensorCores both get work."""
    b16 = _round_up(max(batch, 1), 16)
    if b16 < MIN_SPLIT_ROWS:
        return b16                       # single small tile, grid = 1
    n = 2
    while _round_up(_cdiv(b16, n), 16) > MAX_BATCH_TILE:
        n += 2                           # keep an even number of steps
    return _round_up(_cdiv(b16, n), 16)


def mlp_kernel(x_ref, w1_ref, b1_ref, w2_ref, b2_ref,
               w3_ref, b3_ref, w4_ref, b4_ref, o_ref):
    wdt = w1_ref.dtype
    # fc1 + relu   (dropout1 is identity at inference). x arrives f32 at its
    # true feature width; cast to bf16 in VMEM and contract over K=input_dim.
    h = jnp.dot(x_ref[...].astype(wdt), w1_ref[...],
                preferred_element_type=jnp.float32)
    h = jnp.maximum(h + b1_ref[...], 0.0)
    # fc2 + relu   (dropout2 identity)
    h = jnp.dot(h.astype(wdt), w2_ref[...], preferred_element_type=jnp.float32)
    h = jnp.maximum(h + b2_ref[...], 0.0)
    # fc3 + relu   (dropout3 identity). Hidden-64 is zero-padded to 128 lanes
    # in the prepared weights (exact: ReLU(0)=0, zero rows contribute nothing).
    h = jnp.dot(h.astype(wdt), w3_ref[...], preferred_element_type=jnp.float32)
    h = jnp.maximum(h + b3_ref[...], 0.0)
    # fc4 (logits, no activation). Output is true-width (num_classes columns).
    h = jnp.dot(h.astype(wdt), w4_ref[...], preferred_element_type=jnp.float32)
    o_ref[...] = (h + b4_ref[...]).astype(o_ref.dtype)


def prepare_params(params, weight_dtype=jnp.bfloat16):
    """One-time weight preparation (call once, reuse across forward calls):
    bf16 cast, (1, out) bias layout in f32, and zero-padding of the 64-wide
    hidden layer to 128 lanes. Input dim and num_classes stay at true width."""
    d = params["w1"].shape[0]
    h1 = params["w1"].shape[1]                    # 256
    h2 = params["w2"].shape[1]                    # 128
    h3 = params["w3"].shape[1]                    # 64
    nc = params["w4"].shape[1]                    # num_classes
    h3p = _round_up(h3, LANE)                     # 64 -> 128

    def b2d(b):
        return jnp.asarray(b, jnp.float32).reshape(1, -1)

    prep = {
        "w1": jnp.asarray(params["w1"], jnp.float32).astype(weight_dtype),        # (d, 256)
        "b1": b2d(params["b1"]),                                                   # (1, 256)
        "w2": jnp.asarray(params["w2"], jnp.float32).astype(weight_dtype),        # (256, 128)
        "b2": b2d(params["b2"]),                                                   # (1, 128)
        "w3": _pad2d(jnp.asarray(params["w3"], jnp.float32), h2, h3p).astype(weight_dtype),  # (128, 128)
        "b3": _pad2d(b2d(params["b3"]), 1, h3p),                                   # (1, 128)
        "w4": _pad2d(jnp.asarray(params["w4"], jnp.float32), h3p, nc).astype(weight_dtype),  # (128, nc)
        "b4": b2d(params["b4"]),                                                   # (1, nc)
    }
    del d
    return prep


def emotion_classifier_forward(x, prep, *, batch_tile=None):
    """x: (B, input_dim) float32. prep: output of prepare_params().

    Returns (B, num_classes) float32 logits.
    """
    B, D = x.shape
    assert D == prep["w1"].shape[0], "input_dim mismatch with prepared params"
    num_classes = prep["w4"].shape[1]

    if batch_tile is None:
        tb = _choose_batch_tile(B)
    else:
        tb = batch_tile
        assert tb % 8 == 0, "batch_tile must be a multiple of 8 (16 preferred)"
    b_pad = _round_up(B, tb)
    grid = (b_pad // tb,)

    # Only the (cheap, 40-wide f32) batch pad is ever materialized, and only
    # when B is not already a whole number of tiles.
    x_p = x if b_pad == B else jnp.pad(x, ((0, b_pad - B), (0, 0)))

    # Weights/biases use the same block every grid step -> stay VMEM-resident.
    def const_spec(arr):
        return pl.BlockSpec(arr.shape, lambda i: (0, 0))

    in_specs = [
        pl.BlockSpec((tb, D), lambda i: (i, 0)),   # x tile streams over batch
        const_spec(prep["w1"]), const_spec(prep["b1"]),
        const_spec(prep["w2"]), const_spec(prep["b2"]),
        const_spec(prep["w3"]), const_spec(prep["b3"]),
        const_spec(prep["w4"]), const_spec(prep["b4"]),
    ]
    # True-width output: only num_classes columns ever hit HBM.
    out_spec = pl.BlockSpec((tb, num_classes), lambda i: (i, 0))

    out = pl.pallas_call(
        mlp_kernel,
        out_shape=jax.ShapeDtypeStruct((b_pad, num_classes), jnp.float32),
        grid_spec=pltpu.PrefetchScalarGridSpec(
            num_scalar_prefetch=0,
            grid=grid,
            in_specs=in_specs,
            out_specs=out_spec,
        ),
        compiler_params=pltpu.CompilerParams(
            dimension_semantics=("parallel",)),
    )(x_p, prep["w1"], prep["b1"], prep["w2"], prep["b2"],
      prep["w3"], prep["b3"], prep["w4"], prep["b4"])

    return out if b_pad == B else out[:B]


def init_params(key, input_dim, num_classes):
    """Deterministic init mimicking nn.Linear (uniform +/- 1/sqrt(fan_in))."""
    dims = [(input_dim, 256), (256, 128), (128, 64), (64, num_classes)]
    params = {}
    for idx, (fan_in, fan_out) in enumerate(dims, start=1):
        key, kw, kb = jax.random.split(key, 3)
        bound = 1.0 / jnp.sqrt(jnp.float32(fan_in))
        params[f"w{idx}"] = jax.random.uniform(
            kw, (fan_in, fan_out), jnp.float32, -bound, bound)
        params[f"b{idx}"] = jax.random.uniform(
            kb, (1, fan_out), jnp.float32, -bound, bound)
    return params


def reference_forward(x, params, compute_dtype=jnp.float32):
    """Pure-JAX reference; compute_dtype mirrors the kernel's matmul precision
    (bf16 operands, f32 accumulation, f32 bias/ReLU)."""
    def dot(a, w):
        return jnp.dot(a.astype(compute_dtype), w.astype(compute_dtype),
                       preferred_element_type=jnp.float32)
    h = jnp.maximum(dot(x, params["w1"]) + params["b1"], 0.0)
    h = jnp.maximum(dot(h, params["w2"]) + params["b2"], 0.0)
    h = jnp.maximum(dot(h, params["w3"]) + params["b3"], 0.0)
    return dot(h, params["w4"]) + params["b4"]


if __name__ == "__main__":
    # Small shapes consistent with the module: a batch of feature vectors
    # (e.g. MFCC-derived features) and a handful of emotion classes.
    B, INPUT_DIM, NUM_CLASSES = 8, 40, 8

    key = jax.random.PRNGKey(0)
    key, kx = jax.random.split(key)
    x = jax.random.normal(kx, (B, INPUT_DIM), jnp.float32)
    params = init_params(key, INPUT_DIM, NUM_CLASSES)

    # One-time weight preparation (pad + bf16 cast), reused across calls.
    prep = prepare_params(params)
    fwd = jax.jit(functools.partial(emotion_classifier_forward))

    # TODO(synk): dropout layers are identity here (inference semantics);
    # training-mode stochastic dropout would need pltpu.prng_* in-kernel.
    out = jax.block_until_ready(fwd(x, prep))
    ref = reference_forward(x, params, compute_dtype=jnp.bfloat16)
    assert out.shape == (B, NUM_CLASSES)
    assert jnp.allclose(out, ref, atol=2e-3, rtol=2e-3), "mismatch vs reference"

    # Exercise the multi-step grid + batch-padding path: B=600 -> tb=304,
    # grid=(2,) balanced steps (both v7x TensorCores), batch padded to 608.
    B2 = 600
    key, kx2 = jax.random.split(key)
    x2 = jax.random.normal(kx2, (B2, INPUT_DIM), jnp.float32)
    out2 = jax.block_until_ready(fwd(x2, prep))
    ref2 = reference_forward(x2, params, compute_dtype=jnp.bfloat16)
    assert out2.shape == (B2, NUM_CLASSES)
    assert jnp.allclose(out2, ref2, atol=2e-3, rtol=2e-3), "mismatch (tiled batch)"

    print("KERNEL_OK")
</pallas_src>

<mosaic_0001>
module attributes {stable_mosaic.version = 11 : i64} {
  func.func @mlp_kernel(%arg0: i32, %arg1: memref<16x40xf32, #tpu.memory_space<vmem>>, %arg2: memref<40x256xbf16, #tpu.memory_space<vmem>>, %arg3: memref<1x256xf32, #tpu.memory_space<vmem>>, %arg4: memref<256x128xbf16, #tpu.memory_space<vmem>>, %arg5: memref<1x128xf32, #tpu.memory_space<vmem>>, %arg6: memref<128x128xbf16, #tpu.memory_space<vmem>>, %arg7: memref<1x128xf32, #tpu.memory_space<vmem>>, %arg8: memref<128x8xbf16, #tpu.memory_space<vmem>>, %arg9: memref<1x8xf32, #tpu.memory_space<vmem>>, %arg10: memref<16x8xf32, #tpu.memory_space<vmem>>) attributes {dimension_semantics = [#tpu.dimension_semantics<parallel>], iteration_bounds = array<i64: 1>, scalar_prefetch = 0 : i64, scratch_operands = 0 : i64, tpu.core_type = #tpu.core_type<tc>, window_params = [{transform_indices = @transform_0, window_bounds = array<i64: 16, 40>}, {pipeline_mode = #tpu.pipeline_mode<synchronous>, transform_indices = @transform_1, window_bounds = array<i64: 40, 256>}, {pipeline_mode = #tpu.pipeline_mode<synchronous>, transform_indices = @transform_2, window_bounds = array<i64: 1, 256>}, {pipeline_mode = #tpu.pipeline_mode<synchronous>, transform_indices = @transform_3, window_bounds = array<i64: 256, 128>}, {pipeline_mode = #tpu.pipeline_mode<synchronous>, transform_indices = @transform_4, window_bounds = array<i64: 1, 128>}, {pipeline_mode = #tpu.pipeline_mode<synchronous>, transform_indices = @transform_5, window_bounds = array<i64: 128, 128>}, {pipeline_mode = #tpu.pipeline_mode<synchronous>, transform_indices = @transform_6, window_bounds = array<i64: 1, 128>}, {pipeline_mode = #tpu.pipeline_mode<synchronous>, transform_indices = @transform_7, window_bounds = array<i64: 128, 8>}, {pipeline_mode = #tpu.pipeline_mode<synchronous>, transform_indices = @transform_8, window_bounds = array<i64: 1, 8>}, {transform_indices = @transform_9, window_bounds = array<i64: 16, 8>}]} {
    %c0 = arith.constant 0 : index
    %c0_0 = arith.constant 0 : index
    %0 = vector.load %arg1[%c0, %c0_0] : memref<16x40xf32, #tpu.memory_space<vmem>>, vector<16x40xf32>
    %1 = arith.truncf %0 : vector<16x40xf32> to vector<16x40xbf16>
    %c0_1 = arith.constant 0 : index
    %c0_2 = arith.constant 0 : index
    %2 = vector.load %arg2[%c0_1, %c0_2] : memref<40x256xbf16, #tpu.memory_space<vmem>>, vector<40x256xbf16>
    %cst = arith.constant dense<0.000000e+00> : vector<16x256xf32>
    %3 = tpu.matmul %1, %2, %cst {dimension_numbers = #tpu.dot_dimension_numbers<[1], [0], [0], [1], [0, 0, 1, 1], [], []>} : vector<16x40xbf16>, vector<40x256xbf16>, vector<16x256xf32> -> vector<16x256xf32>
    %c0_3 = arith.constant 0 : index
    %c0_4 = arith.constant 0 : index
    %4 = vector.load %arg3[%c0_3, %c0_4] : memref<1x256xf32, #tpu.memory_space<vmem>>, vector<1x256xf32>
    %5 = vector.broadcast %4 : vector<1x256xf32> to vector<16x256xf32>
    %6 = arith.addf %3, %5 : vector<16x256xf32>
    %cst_5 = arith.constant 0.000000e+00 : f32
    %7 = vector.broadcast %cst_5 : f32 to vector<16x256xf32>
    %8 = arith.maximumf %6, %7 : vector<16x256xf32>
    %9 = arith.truncf %8 : vector<16x256xf32> to vector<16x256xbf16>
    %c0_6 = arith.constant 0 : index
    %c0_7 = arith.constant 0 : index
    %10 = vector.load %arg4[%c0_6, %c0_7] : memref<256x128xbf16, #tpu.memory_space<vmem>>, vector<256x128xbf16>
    %cst_8 = arith.constant dense<0.000000e+00> : vector<16x128xf32>
    %11 = tpu.matmul %9, %10, %cst_8 {dimension_numbers = #tpu.dot_dimension_numbers<[1], [0], [0], [1], [0, 0, 1, 1], [], []>} : vector<16x256xbf16>, vector<256x128xbf16>, vector<16x128xf32> -> vector<16x128xf32>
    %c0_9 = arith.constant 0 : index
    %c0_10 = arith.constant 0 : index
    %12 = vector.load %arg5[%c0_9, %c0_10] : memref<1x128xf32, #tpu.memory_space<vmem>>, vector<1x128xf32>
    %13 = vector.broadcast %12 : vector<1x128xf32> to vector<16x128xf32>
    %14 = arith.addf %11, %13 : vector<16x128xf32>
    %cst_11 = arith.constant 0.000000e+00 : f32
    %15 = vector.broadcast %cst_11 : f32 to vector<16x128xf32>
    %16 = arith.maximumf %14, %15 : vector<16x128xf32>
    %17 = arith.truncf %16 : vector<16x128xf32> to vector<16x128xbf16>
    %c0_12 = arith.constant 0 : index
    %c0_13 = arith.constant 0 : index
    %18 = vector.load %arg6[%c0_12, %c0_13] : memref<128x128xbf16, #tpu.memory_space<vmem>>, vector<128x128xbf16>
    %cst_14 = arith.constant dense<0.000000e+00> : vector<16x128xf32>
    %19 = tpu.matmul %17, %18, %cst_14 {dimension_numbers = #tpu.dot_dimension_numbers<[1], [0], [0], [1], [0, 0, 1, 1], [], []>} : vector<16x128xbf16>, vector<128x128xbf16>, vector<16x128xf32> -> vector<16x128xf32>
    %c0_15 = arith.constant 0 : index
    %c0_16 = arith.constant 0 : index
    %20 = vector.load %arg7[%c0_15, %c0_16] : memref<1x128xf32, #tpu.memory_space<vmem>>, vector<1x128xf32>
    %21 = vector.broadcast %20 : vector<1x128xf32> to vector<16x128xf32>
    %22 = arith.addf %19, %21 : vector<16x128xf32>
    %cst_17 = arith.constant 0.000000e+00 : f32
    %23 = vector.broadcast %cst_17 : f32 to vector<16x128xf32>
    %24 = arith.maximumf %22, %23 : vector<16x128xf32>
    %25 = arith.truncf %24 : vector<16x128xf32> to vector<16x128xbf16>
    %c0_18 = arith.constant 0 : index
    %c0_19 = arith.constant 0 : index
    %26 = vector.load %arg8[%c0_18, %c0_19] : memref<128x8xbf16, #tpu.memory_space<vmem>>, vector<128x8xbf16>
    %cst_20 = arith.constant dense<0.000000e+00> : vector<16x8xf32>
    %27 = tpu.matmul %25, %26, %cst_20 {dimension_numbers = #tpu.dot_dimension_numbers<[1], [0], [0], [1], [0, 0, 1, 1], [], []>} : vector<16x128xbf16>, vector<128x8xbf16>, vector<16x8xf32> -> vector<16x8xf32>
    %c0_21 = arith.constant 0 : index
    %c0_22 = arith.constant 0 : index
    %28 = vector.load %arg9[%c0_21, %c0_22] : memref<1x8xf32, #tpu.memory_space<vmem>>, vector<1x8xf32>
    %29 = vector.broadcast %28 : vector<1x8xf32> to vector<16x8xf32>
    %30 = arith.addf %27, %29 : vector<16x8xf32>
    %c0_23 = arith.constant 0 : index
    %c0_24 = arith.constant 0 : index
    %31 = vector.load %arg10[%c0_23, %c0_24] : memref<16x8xf32, #tpu.memory_space<vmem>>, vector<16x8xf32>
    tpu.vector_store %arg10[%c0_23, %c0_24], %30 {strides = array<i32>} : memref<16x8xf32, #tpu.memory_space<vmem>>, vector<16x8xf32>,
    return
  }
  func.func @transform_0(%arg0: i32) -> (i32, i32) {
    %c0_i32 = arith.constant 0 : i32
    %c0_i32_0 = arith.constant 0 : i32
    return %arg0, %c0_i32 : i32, i32
  }
  func.func @transform_1(%arg0: i32) -> (i32, i32) {
    %c0_i32 = arith.constant 0 : i32
    %c0_i32_0 = arith.constant 0 : i32
    %c0_i32_1 = arith.constant 0 : i32
    return %c0_i32, %c0_i32_0 : i32, i32
  }
  func.func @transform_2(%arg0: i32) -> (i32, i32) {
    %c0_i32 = arith.constant 0 : i32
    %c0_i32_0 = arith.constant 0 : i32
    %c0_i32_1 = arith.constant 0 : i32
    return %c0_i32, %c0_i32_0 : i32, i32
  }
  func.func @transform_3(%arg0: i32) -> (i32, i32) {
    %c0_i32 = arith.constant 0 : i32
    %c0_i32_0 = arith.constant 0 : i32
    %c0_i32_1 = arith.constant 0 : i32
    return %c0_i32, %c0_i32_0 : i32, i32
  }
  func.func @transform_4(%arg0: i32) -> (i32, i32) {
    %c0_i32 = arith.constant 0 : i32
    %c0_i32_0 = arith.constant 0 : i32
    %c0_i32_1 = arith.constant 0 : i32
    return %c0_i32, %c0_i32_0 : i32, i32
  }
  func.func @transform_5(%arg0: i32) -> (i32, i32) {
    %c0_i32 = arith.constant 0 : i32
    %c0_i32_0 = arith.constant 0 : i32
    %c0_i32_1 = arith.constant 0 : i32
    return %c0_i32, %c0_i32_0 : i32, i32
  }
  func.func @transform_6(%arg0: i32) -> (i32, i32) {
    %c0_i32 = arith.constant 0 : i32
    %c0_i32_0 = arith.constant 0 : i32
    %c0_i32_1 = arith.constant 0 : i32
    return %c0_i32, %c0_i32_0 : i32, i32
  }
  func.func @transform_7(%arg0: i32) -> (i32, i32) {
    %c0_i32 = arith.constant 0 : i32
    %c0_i32_0 = arith.constant 0 : i32
    %c0_i32_1 = arith.constant 0 : i32
    return %c0_i32, %c0_i32_0 : i32, i32
  }
  func.func @transform_8(%arg0: i32) -> (i32, i32) {
    %c0_i32 = arith.constant 0 : i32
    %c0_i32_0 = arith.constant 0 : i32
    %c0_i32_1 = arith.constant 0 : i32
    return %c0_i32, %c0_i32_0 : i32, i32
  }
  func.func @transform_9(%arg0: i32) -> (i32, i32) {
    %c0_i32 = arith.constant 0 : i32
    %c0_i32_0 = arith.constant 0 : i32
    return %arg0, %c0_i32 : i32, i32
  }
}

</mosaic_0001>

<bundles_post_ra>
// kernel: emotion_classifier_forward.1
= control target key start
LH: loop header
LB: loop body
LE: loop exit
PB: predicated region body
PF: predicated region fallthrough
CT: control target
= control target key end

     0   :  { %14 = vsyncpa [#allocation3], 0  ;;  %s759_s30 = smov [#allocation2]   ;;  %s932_s0 = inlined_call_operand.vmem [shape: f32[16,40], index: 0, kind: input, shape index: {}]   ;;  %s933_s1 = inlined_call_operand.vmem [shape: bf16[40,256], index: 1, kind: input, shape index: {}]   ;;  %s934_s2 = inlined_call_operand.vmem [shape: f32[1,256], index: 2, kind: input, shape index: {}]   ;;  %s935_s3 = inlined_call_operand.hbm [shape: bf16[256,128], index: 3, kind: input, shape index: {}]   ;;  %s936_s4 = inlined_call_operand.vmem [shape: f32[1,128], index: 4, kind: input, shape index: {}]   ;;  %s937_s5 = inlined_call_operand.vmem [shape: bf16[128,128], index: 5, kind: input, shape index: {}]   ;;  %s938_s6 = inlined_call_operand.vmem [shape: f32[1,128], index: 6, kind: input, shape index: {}]   ;;  %s939_s7 = inlined_call_operand.vmem [shape: bf16[128,8], index: 7, kind: input, shape index: {}]   ;;  %s940_s8 = inlined_call_operand.vmem [shape: f32[1,8], index: 8, kind: input, shape index: {}]   ;;  %s941_s9 = inlined_call_operand.vmem [shape: f32[16,8], index: 9, kind: output, shape index: {}]  }
   0x1   :  { %s26_s10 = sshll.u32 %s759_s30, 4  ;;  %s735_s13 = scalar_lea.hbm %s935_s3, 2048  ;;  %s27_s10 = int_to_ptr.vmem [resolvable:$true] %s26_s10 }
   0x2   :  { %p736_p0 = scmp.ne.s32.totalorder %s935_s3, %s735_s13  ;;  %p739_p1 = scmp.lt.u32.totalorder %s735_s13, %s935_s3 }
   0x4   :  { %p741_p2 = pnand %p739_p1, %p736_p0 }
   0x6   :  { %744 = shalt.err (!%p741_p2)
}
   0x7   :  { %s745_s18 = scalar_lea.vmem %s27_s10, 2048  ;;  %p750_p4 = scmp.lt.s32.totalorder %s27_s10, %s27_s10 }
   0x8   :  { %p746_p3 = scmp.ne.s32.totalorder %s27_s10, %s745_s18  ;;  %p751_p5 = scmp.lt.s32.totalorder %s745_s18, %s745_s18 }
   0xa   :  { %p752_p6 = por %p751_p5, %p750_p4 }
   0xc   :  { %p753_p7 = pnand %p752_p6, %p746_p3 }
   0xe   :  { %756 = shalt.err (!%p753_p7)
}
   0xf   :  { %s760_s19 = smov 64   ;;  %s761_s20 = smov 4  }
  0x10   :  { %32 = dma.hbm_to_vmem [thread:$0]  %s935_s3, 2048, %s27_s10, [#allocation3], %s760_s19, %s760_s19, %s761_s20  }
  0x11   :  { %757 = dma.done.wait [#allocation3], 2048  }
  0x12   :  { %758 = vsyncadd [#allocation3], 4294965248  ;;  %v762_v0 = vmov 0   ;;  %v695_v1 = vld [vmem:[%s933_s1 + $0x4] ss:$8 sps:$4 sm:$0xff]   ;;  %vm96_vm0 = vcmask 1043456   ;;  %v57_v34 = vlaneseq }
  0x13   :  { %135 = vmatprep.mubr.bf16.mxu0 %v762_v0  ;;  %v697_v2 = vld [vmem:[%s933_s1] ss:$8 sps:$4 sm:$0xff]   ;;  %103 = vmatprep.subr.bf16.mxu0 %v695_v1  ;;  %v698_v3 = vld [vmem:[%s933_s1 + $0x14] ss:$8 sps:$4 sm:$0xff]   ;;  %v700_v5 = vld [vmem:[%s933_s1 + $0x10] ss:$8 sps:$4 sm:$0xff]  }
  0x14   :  { %v54_v4 = vld [vmem:[%s933_s1 + $0x20] sm:$0xff]  ;;  %104 = vmatpush1.bf16.msra.mxu0 %v697_v2  ;;  %v48_v10 = vld [vmem:[%s932_s0 + $0x8] sm:$0xff]  ;;  %v707_v15 = vld [vmem:[#allocation2 + $0x50] sm:$0xff]   ;;  %vm92_vm1 = vcmask 326656   ;;  %v763_v29 = vmov 0.0   ;;  %v58_v35 = vshrl.u32 %v57_v34, 7 }
  0x15   :  { %105 = vmatprep.subr.bf16.mxu0 %v698_v3  ;;  %v571_v6 = vcombine.high %v54_v4, %v54_v4  ;;  %v570_v7 = vcombine.low %v54_v4, %v54_v4  ;;  %v703_v8 = vld [vmem:[#allocation2 + $0x40] sm:$0xff]   ;;  %v705_v12 = vld [vmem:[#allocation2 + $0x48] sm:$0xff]   ;;  %v708_v17 = vld [vmem:[#allocation2 + $0x10] sm:$0xff]   ;;  %vm764_vm2 = vmmov 0   ;;  %vm558_vm3 = vcmask 64512  }
  0x16   :  { %v47_v9 = vld [vmem:[%s932_s0] sm:$0xff]  ;;  %609 = vmatprep.subr.bf16.mxu1 %v703_v8  ;;  %v706_v13 = vld [vmem:[#allocation2 + $0x8] sm:$0xff]   ;;  %v709_v18 = vld [vmem:[#allocation2 + $0x58] sm:$0xff]   ;;  %v59_v36 = vsub.s32 0, %v58_v35  ;;  %v63_v38 = vsub.s32 1, %v58_v35 }
  0x17   :  { %v704_v11 = vld [vmem:[#allocation2] sm:$0xff]   ;;  %v98_v14 = vsel %vm96_vm0, %v570_v7, 0  ;;  %v49_v16 = vpack.c.bf16 %v48_v10, %v47_v9  ;;  %v710_v19 = vld [vmem:[#allocation2 + $0x18] sm:$0xff]   ;;  %v713_v22 = vld [vmem:[#allocation2 + $0x68] sm:$0xff]  }
  0x18   :  { %106 = vmatpush1.bf16.msra.mxu0 %v700_v5  ;;  %610 = vmatpush3.bf16.msra.mxu1 %v704_v11  ;;  %v711_v20 = vld [vmem:[#allocation2 + $0x60] sm:$0xff]   ;;  %v714_v23 = vld [vmem:[#allocation2 + $0x28] sm:$0xff]   ;;  %v715_v24 = vld [vmem:[#allocation2 + $0x70] sm:$0xff]  }
  0x19   :  { %572 = vmatprep.subr.msk.bf16.mxu0 %vm96_vm0, %v571_v6  ;;  %611 = vmatprep.subr.bf16.mxu1 %v705_v12  ;;  %v712_v21 = vld [vmem:[#allocation2 + $0x20] sm:$0xff]   ;;  %v716_v25 = vld [vmem:[#allocation2 + $0x30] sm:$0xff]   ;;  %v717_v26 = vld [vmem:[#allocation2 + $0x78] sm:$0xff]  }
  0x1a   :  { %v718_v27 = vld [vmem:[#allocation2 + $0x38] sm:$0xff]   ;;  %v719_v28 = vld [vmem:[%s937_s5] sm:$0xff]   ;;  %v720_v30 = vld [vmem:[%s937_s5 + $0x8] sm:$0xff]  }
  0x1b   :  { %v721_v31 = vld [vmem:[%s937_s5 + $0x10] sm:$0xff]   ;;  %v722_v32 = vld [vmem:[%s937_s5 + $0x18] sm:$0xff]   ;;  %v723_v33 = vld [vmem:[%s937_s5 + $0x20] sm:$0xff]  }
  0x1c   :  { %108 = vmatpush1.bf16.msra.mxu0 %v98_v14  ;;  %612 = vmatpush3.bf16.msra.mxu1 %v706_v13  ;;  %v55_v37 = vld [vmem:[%s934_s2] sm:$0x3]  ;;  %v724_v55 = vld [vmem:[%s937_s5 + $0x28] sm:$0xff]   ;;  %v725_v56 = vld [vmem:[%s937_s5 + $0x30] sm:$0xff]  }
  0x1d   :  { %613 = vmatprep.subr.bf16.mxu1 %v707_v15  ;;  %649 = vmatprep.subr.bf16.mxu0 %v763_v29  ;;  %v60_v39 = vrot.slane %v55_v37, %v59_v36  ;;  %v64_v40 = vrot.slane %v55_v37, %v63_v38  ;;  %v726_v57 = vld [vmem:[%s937_s5 + $0x38] sm:$0xff]   ;;  %v727_v58 = vld [vmem:[%s939_s7] sm:$0xff]   ;;  %v728_v59 = vld [vmem:[%s939_s7 + $0x8] sm:$0xff]  }
  0x1e   :  { %v729_v60 = vld [vmem:[%s939_s7 + $0x10] sm:$0xff]   ;;  %v730_v61 = vld [vmem:[%s939_s7 + $0x18] sm:$0xff]   ;;  %v731_v62 = vld [vmem:[%s939_s7 + $0x20] sm:$0xff]  }
  0x1f   :  { %573 = vmatmul.mubr.msk.bf16.vlgmr.msra.gmra.mrb[0].mxu0 %vm92_vm1, %v49_v16  ;;  %v732_v63 = vld [vmem:[%s939_s7 + $0x28] sm:$0xff]   ;;  %v574_v1 = vld [vmem:[%s936_s4] ss:$0 sm:$0xff]  ;;  %v733_v12 = vld [vmem:[%s939_s7 + $0x30] sm:$0xff]  }
  0x20   :  { %614 = vmatpush3.bf16.msra.mxu1 %v708_v17  ;;  %650 = vmatpush3.bf16.msra.mxu0 %v719_v28  ;;  %v734_v13 = vld [vmem:[%s939_s7 + $0x38] sm:$0xff]   ;;  %v591_v14 = vld [vmem:[%s938_s6] ss:$0 sm:$0xff] }
  0x21   :  { %615 = vmatprep.subr.bf16.mxu1 %v709_v18  ;;  %651 = vmatprep.subr.bf16.mxu0 %v763_v29 }
  0x22   :  { %665 = vmatprep.mubr.msk.bf16.mxu0 %vm764_vm2, %v763_v29 }
  0x24   :  { %616 = vmatpush3.bf16.msra.mxu1 %v710_v19  ;;  %652 = vmatpush3.bf16.msra.mxu0 %v720_v30 }
  0x25   :  { %617 = vmatprep.subr.bf16.mxu1 %v711_v20  ;;  %653 = vmatprep.subr.bf16.mxu0 %v763_v29 }
  0x28   :  { %618 = vmatpush3.bf16.msra.mxu1 %v712_v21  ;;  %654 = vmatpush3.bf16.msra.mxu0 %v721_v31 }
  0x29   :  { %619 = vmatprep.subr.bf16.mxu1 %v713_v22  ;;  %655 = vmatprep.subr.bf16.mxu0 %v763_v29 }
  0x2c   :  { %620 = vmatpush3.bf16.msra.mxu1 %v714_v23  ;;  %656 = vmatpush3.bf16.msra.mxu0 %v722_v32 }
  0x2d   :  { %621 = vmatprep.subr.bf16.mxu1 %v715_v24  ;;  %657 = vmatprep.subr.bf16.mxu0 %v763_v29  ;;  %v600_v24 = vld [vmem:[%s940_s8] ss:$0 sm:$0xff] }
  0x30   :  { %622 = vmatpush3.bf16.msra.mxu1 %v716_v25  ;;  %658 = vmatpush3.bf16.msra.mxu0 %v723_v33 }
  0x31   :  { %623 = vmatprep.subr.bf16.mxu1 %v717_v26  ;;  %659 = vmatprep.subr.bf16.mxu0 %v763_v29 }
  0x34   :  { %624 = vmatpush3.bf16.msra.mxu1 %v718_v27  ;;  %660 = vmatpush3.bf16.msra.mxu0 %v724_v55 }
  0x35   :  { %669 = vmatprep.subr.bf16.mxu1 %v763_v29  ;;  %661 = vmatprep.subr.bf16.mxu0 %v763_v29 }
  0x38   :  { %662 = vmatpush3.bf16.msra.mxu0 %v725_v56 }
  0x39   :  { %663 = vmatprep.subr.bf16.mxu0 %v763_v29 }
  0x3c   :  { %664 = vmatpush3.bf16.msra.mxu0 %v726_v57 }
  0xf2   :  { %v137_v41 = vpop.f32.mrb[0].mxu0 }
  0xf3   :  { %v138_v42 = vadd.f32 %v137_v41, %v60_v39  ;;  %v139_v43 = vpop.f32.mrb[1].mxu0 }
  0xf4   :  { %v140_v44 = vadd.f32 %v139_v43, %v64_v40  ;;  %v141_v45 = vpop.f32.mrb[2].mxu0 }
  0xf5   :  { %v142_v46 = vadd.f32 %v141_v45, %v60_v39  ;;  %v143_v47 = vpop.f32.mrb[3].mxu0  ;;  %v146_v49 = vmax.f32 %v138_v42, 0.0 }
  0xf6   :  { %v144_v48 = vadd.f32 %v143_v47, %v64_v40  ;;  %v147_v51 = vmax.f32 %v140_v44, 0.0 }
  0xf7   :  { %v148_v50 = vmax.f32 %v142_v46, 0.0 }
  0xf8   :  { %v149_v52 = vmax.f32 %v144_v48, 0.0 }
  0xf9   :  { %v150_v53 = vpack.c.bf16 %v148_v50, %v146_v49 }
  0xfa   :  { %v151_v54 = vpack.c.bf16 %v149_v52, %v147_v51 }
  0xfc   :  { %319 = vmatprep.mubr.bf16.mxu1 %v151_v54 }
  0xfd   :  { %320 = vmatmul.mubr.bf16.vlgmr.msra.gmra.mrb[0].mxu1 %v150_v53 }
  0xfe   :  { %685 = vmatprep.mubr.msk.bf16.mxu1 %vm764_vm2, %v763_v29  ;;  %670 = vmatpush3.bf16.msra.mxu1 %v727_v58 }
  0xff   :  { %671 = vmatprep.subr.bf16.mxu1 %v763_v29 }
 0x102   :  { %672 = vmatpush3.bf16.msra.mxu1 %v728_v59 }
 0x103   :  { %673 = vmatprep.subr.bf16.mxu1 %v763_v29 }
 0x106   :  { %674 = vmatpush3.bf16.msra.mxu1 %v729_v60 }
 0x107   :  { %675 = vmatprep.subr.bf16.mxu1 %v763_v29 }
 0x10a   :  { %676 = vmatpush3.bf16.msra.mxu1 %v730_v61 }
 0x10b   :  { %677 = vmatprep.subr.bf16.mxu1 %v763_v29 }
 0x10e   :  { %678 = vmatpush3.bf16.msra.mxu1 %v731_v62 }
 0x10f   :  { %679 = vmatprep.subr.bf16.mxu1 %v763_v29 }
 0x112   :  { %680 = vmatpush3.bf16.msra.mxu1 %v732_v63 }
 0x113   :  { %681 = vmatprep.subr.bf16.mxu1 %v763_v29 }
 0x116   :  { %682 = vmatpush3.bf16.msra.mxu1 %v733_v12 }
 0x117   :  { %683 = vmatprep.subr.bf16.mxu1 %v763_v29 }
 0x11a   :  { %684 = vmatpush3.bf16.msra.mxu1 %v734_v13 }
 0x1d0   :  { %v625_v0 = vpop.f32.mrb[0].mxu1 }
 0x1d1   :  { %v626_v2 = vpop.f32.mrb[1].mxu1 }
 0x1d2   :  { %v627_v3 = vadd.f32 %v626_v2, %v625_v0  ;;  %v628_v4 = vpop.f32.mrb[2].mxu1 }
 0x1d3   :  { %v629_v5 = vpop.f32.mrb[3].mxu1 }
 0x1d4   :  { %v322_v6 = vadd.f32 %v627_v3, %v574_v1  ;;  %v630_v7 = vadd.f32 %v629_v5, %v628_v4 }
 0x1d6   :  { %v325_v8 = vadd.f32 %v630_v7, %v574_v1  ;;  %v328_v9 = vmax.f32 %v322_v6, 0.0 }
 0x1d8   :  { %v329_v10 = vmax.f32 %v325_v8, 0.0 }
 0x1da   :  { %v330_v11 = vpack.c.bf16 %v329_v10, %v328_v9 }
 0x1dc   :  { %666 = vmatmul.mubr.bf16.vlgmr.msra.gmra.mrb[4].mxu0 %v330_v11 }
 0x2af   :  { %v436_v15 = vpop.f32.mrb[4].mxu0 }
 0x2b0   :  { %v437_v16 = vadd.f32 %v591_v14, %v436_v15  ;;  %v667_v17 = vpop.f32.mrb[5].mxu0 }
 0x2b1   :  { %v439_v18 = vpop.f32.mrb[6].mxu0 }
 0x2b2   :  { %v440_v19 = vadd.f32 %v591_v14, %v439_v18  ;;  %v668_v20 = vpop.f32.mrb[7].mxu0  ;;  %v443_v21 = vmax.f32 %v437_v16, 0.0 }
 0x2b4   :  { %v444_v22 = vmax.f32 %v440_v19, 0.0 }
 0x2b6   :  { %v445_v23 = vpack.c.bf16 %v444_v22, %v443_v21 }
 0x2b8   :  { %686 = vmatmul.mubr.bf16.vlgmr.msra.gmra.mrb[4].mxu1 %v445_v23 }
 0x38b   :  { %v551_v25 = vpop.f32.mrb[4].mxu1 }
 0x38c   :  { %v552_v26 = vadd.f32 %v600_v24, %v551_v25  ;;  %v687_v27 = vpop.f32.mrb[5].mxu1 }
 0x38d   :  { %v554_v28 = vpop.f32.mrb[6].mxu1 }
 0x38e   :  { %559 = vst.msk [vmem:[%s941_s9] sm:$0xff] %vm558_vm3, %v552_v26  ;;  %v555_v29 = vadd.f32 %v600_v24, %v554_v28  ;;  %v688_v30 = vpop.f32.mrb[7].mxu1 }
 0x390   :  { %560 = vst.msk [vmem:[%s941_s9 + $0x8] sm:$0xff] %vm558_vm3, %v555_v29 }
 0x391   :  { %565 = vsyncpa [#allocation3], 1 }

</bundles_post_ra>
